<compile_context>
chip_gen: v5e
topology: v5e:2x2
jax: 0.10.0
libtpu: 0.0.40
codegen_flags: <defaults>
</compile_context>

<pallas_src>
import jax
import jax.numpy as jnp
from jax.experimental import pallas as pl
from jax.experimental.pallas import tpu as pltpu

_HIDDEN = (36, 72, 144, 72, 36)   # fixed by the PyTorch module
_OUT_PAD = 128                    # lane-dense padded output width
_TM_CAP = 2048                    # max batch tile (keeps >=2 grid steps for v7x megacore)


def _round_up(a, b):
    return ((a + b - 1) // b) * b


def _pick_tile_m(batch):
    """Largest MXU/DMA-friendly batch tile, capped so the grid has >=2 steps when possible."""
    if batch <= 32:
        return max(16, _round_up(batch, 16))          # tiny batch: one (possibly ragged) block
    two_step = _round_up(pl.cdiv(batch, 2), 16)       # >= 2 grid steps -> both v7x TCs busy
    return min(_TM_CAP, two_step)


def _leaky_relu(x, slope=0.01):   # PyTorch LeakyReLU default negative_slope
    return jnp.where(x > 0, x, slope * x)


def mlp_kernel(x_ref, w1_ref, w2_ref, w3_ref, w4_ref, w5_ref, wo_ref,
               shifts_ref, out_ref):
    """Whole forward fused; BN scale pre-folded into weights, shifts packed into one ref.

    Stores bf16 LOGITS on a lane-dense (tm, 128) tile; sigmoid + column slice happen outside.
    """
    cdt = w1_ref.dtype  # bf16 compute dtype

    # layer_1 (+ folded BN1) + LeakyReLU   (cast x f32 -> bf16 in-kernel)
    h = jnp.dot(x_ref[...].astype(cdt), w1_ref[...], preferred_element_type=jnp.float32)
    h = _leaky_relu(h + shifts_ref[0:1, 0:36])

    # layer_2 (+ folded BN2) + LeakyReLU   (dropout == identity in eval mode)
    h = jnp.dot(h.astype(cdt), w2_ref[...], preferred_element_type=jnp.float32)
    h = _leaky_relu(h + shifts_ref[1:2, 0:72])

    # layer_3 (+ folded BN3) + LeakyReLU
    h = jnp.dot(h.astype(cdt), w3_ref[...], preferred_element_type=jnp.float32)
    h = _leaky_relu(h + shifts_ref[2:3, 0:144])

    # layer_4 (+ folded BN4) + LeakyReLU
    h = jnp.dot(h.astype(cdt), w4_ref[...], preferred_element_type=jnp.float32)
    h = _leaky_relu(h + shifts_ref[3:4, 0:72])

    # layer_5 (+ folded BN5) + LeakyReLU
    h = jnp.dot(h.astype(cdt), w5_ref[...], preferred_element_type=jnp.float32)
    h = _leaky_relu(h + shifts_ref[4:5, 0:36])

    # layer_out: lane-dense 128-wide bf16 logits (extra columns are zero-weight -> logit 0)
    logits = jnp.dot(h.astype(cdt), wo_ref[...], preferred_element_type=jnp.float32)
    out_ref[...] = logits.astype(out_ref.dtype)


def multiclass_classification_forward(x, params, *, compute_dtype=jnp.bfloat16):
    """params: 'w1'..'w5','wo' stored as (in, out) f32, and BN tuples 'bn1'..'bn5'
    = (gamma, beta, running_mean, running_var)."""
    eps = 1e-5  # PyTorch BatchNorm1d default
    batch, num_feature = x.shape
    num_class = params["wo"].shape[1]
    max_hidden = max(_HIDDEN)

    # ---- fold BN scale into the (bias-free) Linear weights; pack shifts into one operand ----
    folded = []
    shift_rows = []
    for i, d in enumerate(_HIDDEN):
        gamma, beta, mean, var = params[f"bn{i + 1}"]
        scale = gamma * jax.lax.rsqrt(var + eps)                 # (d,)
        shift = beta - mean * scale                              # (d,)
        w = params[f"w{i + 1}"] * scale[None, :]                 # exact: Linear has no bias
        folded.append(w.astype(compute_dtype))
        shift_rows.append(jnp.pad(shift.astype(jnp.float32), (0, max_hidden - d)))
    shifts = jnp.stack(shift_rows, axis=0)                       # (5, 144) f32, single DMA
    w1, w2, w3, w4, w5 = folded

    # lane-dense final projection: zero-pad num_class -> 128 output lanes
    wo = jnp.pad(params["wo"], ((0, 0), (0, _OUT_PAD - num_class))).astype(compute_dtype)

    # ---- batch tiling: big tiles, ragged last block handled by Pallas (no wrapper pad/cast) ----
    tm = _pick_tile_m(batch)
    grid = (pl.cdiv(batch, tm),)

    def resident(arr):   # full-array block, same index every step -> no re-DMA across the grid
        return pl.BlockSpec(arr.shape, lambda i: (0, 0))

    in_specs = [
        pl.BlockSpec((tm, num_feature), lambda i: (i, 0)),       # x: pipelined over batch (f32)
        resident(w1), resident(w2), resident(w3), resident(w4), resident(w5), resident(wo),
        resident(shifts),
    ]
    out_spec = pl.BlockSpec((tm, _OUT_PAD), lambda i: (i, 0))

    w_itemsize = jnp.dtype(compute_dtype).itemsize
    weight_bytes = sum(int(w.size) * w_itemsize for w in (w1, w2, w3, w4, w5, wo))
    flops_per_row = 2 * (num_feature * 36 + 36 * 72 + 72 * 144 + 144 * 72 + 72 * 36
                         + 36 * _OUT_PAD)
    cost = pl.CostEstimate(
        flops=int(batch * flops_per_row),
        transcendentals=0,
        bytes_accessed=int(x.size * x.dtype.itemsize + weight_bytes + shifts.size * 4
                           + batch * _OUT_PAD * w_itemsize),
    )

    logits = pl.pallas_call(
        mlp_kernel,
        out_shape=jax.ShapeDtypeStruct((batch, _OUT_PAD), compute_dtype),
        grid=grid,
        in_specs=in_specs,
        out_specs=out_spec,
        compiler_params=pltpu.CompilerParams(dimension_semantics=("parallel",)),
        cost_estimate=cost,
    )(x, w1, w2, w3, w4, w5, wo, shifts)

    # slice off lane padding, then sigmoid (fuses with the slice in XLA; done in f32)
    return jax.nn.sigmoid(logits[:batch, :num_class].astype(jnp.float32))


def _reference_forward(x, params):
    """Pure-JAX f32 reference of the PyTorch module in eval mode."""
    eps = 1e-5
    h = x.astype(jnp.float32)
    for i in range(5):
        h = h @ params[f"w{i + 1}"]
        gamma, beta, mean, var = params[f"bn{i + 1}"]
        h = (h - mean) * (gamma * jax.lax.rsqrt(var + eps)) + beta
        h = jnp.where(h > 0, h, 0.01 * h)
    return jax.nn.sigmoid(h @ params["wo"])


def init_params(key, num_feature, num_class):
    """Deterministic synthetic parameters (shapes follow the PyTorch module)."""
    dims = [num_feature, 36, 72, 144, 72, 36, num_class]
    keys = jax.random.split(key, 6)
    params = {}
    for i, name in enumerate(["w1", "w2", "w3", "w4", "w5", "wo"]):
        fan_in, fan_out = dims[i], dims[i + 1]
        # stored as (in, out) == transpose of PyTorch's (out, in)
        params[name] = (jax.random.normal(keys[i], (fan_in, fan_out), jnp.float32)
                        / jnp.sqrt(jnp.float32(fan_in)))
    for i, d in enumerate(_HIDDEN):
        gamma = 1.0 + 0.01 * jnp.arange(d, dtype=jnp.float32)
        beta = 0.05 * jnp.arange(d, dtype=jnp.float32) / d
        running_mean = 0.1 * jnp.sin(jnp.arange(d, dtype=jnp.float32))
        running_var = 1.0 + 0.1 * jnp.cos(jnp.arange(d, dtype=jnp.float32)) ** 2
        params[f"bn{i + 1}"] = (gamma, beta, running_mean, running_var)
    return params


if __name__ == "__main__":
    num_feature = 20
    num_class = 5
    batch = 16

    key = jax.random.PRNGKey(0)
    k_x, k_p = jax.random.split(key)
    x = jax.random.normal(k_x, (batch, num_feature), jnp.float32)
    params = init_params(k_p, num_feature, num_class)

    fwd = jax.jit(multiclass_classification_forward)
    out = fwd(x, params)
    jax.block_until_ready(out)

    assert out.shape == (batch, num_class)
    assert bool(jnp.all(jnp.isfinite(out)))
    assert bool(jnp.all((out >= 0.0) & (out <= 1.0)))  # sigmoid output range

    # compare against f32 reference (kernel uses bf16 weights/activations/logits -> loose tol)
    ref = _reference_forward(x, params)
    assert float(jnp.max(jnp.abs(out - ref))) < 0.1

    # TODO(synk): training-mode stochastic Dropout and batch-statistics BatchNorm are not
    # reproduced (eval-mode semantics: dropout == identity, BN uses running stats).
    print("KERNEL_OK")
</pallas_src>

<mosaic_0001>
module attributes {stable_mosaic.version = 11 : i64} {
  func.func @mlp_kernel(%arg0: i32, %arg1: memref<16x20xf32, #tpu.memory_space<vmem>>, %arg2: memref<20x36xbf16, #tpu.memory_space<vmem>>, %arg3: memref<36x72xbf16, #tpu.memory_space<vmem>>, %arg4: memref<72x144xbf16, #tpu.memory_space<vmem>>, %arg5: memref<144x72xbf16, #tpu.memory_space<vmem>>, %arg6: memref<72x36xbf16, #tpu.memory_space<vmem>>, %arg7: memref<36x128xbf16, #tpu.memory_space<vmem>>, %arg8: memref<5x144xf32, #tpu.memory_space<vmem>>, %arg9: memref<16x128xbf16, #tpu.memory_space<vmem>>) attributes {dimension_semantics = [#tpu.dimension_semantics<parallel>], iteration_bounds = array<i64: 1>, scalar_prefetch = 0 : i64, scratch_operands = 0 : i64, tpu.core_type = #tpu.core_type<tc>, window_params = [{transform_indices = @transform_0, window_bounds = array<i64: 16, 20>}, {pipeline_mode = #tpu.pipeline_mode<synchronous>, transform_indices = @transform_1, window_bounds = array<i64: 20, 36>}, {pipeline_mode = #tpu.pipeline_mode<synchronous>, transform_indices = @transform_2, window_bounds = array<i64: 36, 72>}, {pipeline_mode = #tpu.pipeline_mode<synchronous>, transform_indices = @transform_3, window_bounds = array<i64: 72, 144>}, {pipeline_mode = #tpu.pipeline_mode<synchronous>, transform_indices = @transform_4, window_bounds = array<i64: 144, 72>}, {pipeline_mode = #tpu.pipeline_mode<synchronous>, transform_indices = @transform_5, window_bounds = array<i64: 72, 36>}, {pipeline_mode = #tpu.pipeline_mode<synchronous>, transform_indices = @transform_6, window_bounds = array<i64: 36, 128>}, {pipeline_mode = #tpu.pipeline_mode<synchronous>, transform_indices = @transform_7, window_bounds = array<i64: 5, 144>}, {transform_indices = @transform_8, window_bounds = array<i64: 16, 128>}]} {
    %c0 = arith.constant 0 : index
    %c0_0 = arith.constant 0 : index
    %0 = vector.load %arg1[%c0, %c0_0] : memref<16x20xf32, #tpu.memory_space<vmem>>, vector<16x20xf32>
    %1 = arith.truncf %0 : vector<16x20xf32> to vector<16x20xbf16>
    %c0_1 = arith.constant 0 : index
    %c0_2 = arith.constant 0 : index
    %2 = vector.load %arg2[%c0_1, %c0_2] : memref<20x36xbf16, #tpu.memory_space<vmem>>, vector<20x36xbf16>
    %cst = arith.constant dense<0.000000e+00> : vector<16x36xf32>
    %3 = tpu.matmul %1, %2, %cst {dimension_numbers = #tpu.dot_dimension_numbers<[1], [0], [0], [1], [0, 0, 1, 1], [], []>} : vector<16x20xbf16>, vector<20x36xbf16>, vector<16x36xf32> -> vector<16x36xf32>
    %c0_3 = arith.constant 0 : index
    %c0_4 = arith.constant 0 : index
    %4 = vector.load %arg8[%c0_3, %c0_4] : memref<5x144xf32, #tpu.memory_space<vmem>>, vector<1x36xf32>
    %5 = vector.broadcast %4 : vector<1x36xf32> to vector<16x36xf32>
    %6 = arith.addf %3, %5 : vector<16x36xf32>
    %cst_5 = arith.constant 0.000000e+00 : f32
    %7 = vector.broadcast %cst_5 : f32 to vector<16x36xf32>
    %8 = arith.cmpf ogt, %6, %7 : vector<16x36xf32>
    %cst_6 = arith.constant 0.00999999977 : f32
    %9 = vector.broadcast %cst_6 : f32 to vector<16x36xf32>
    %10 = arith.mulf %9, %6 : vector<16x36xf32>
    %11 = arith.select %8, %6, %10 : vector<16x36xi1>, vector<16x36xf32>
    %12 = arith.truncf %11 : vector<16x36xf32> to vector<16x36xbf16>
    %c0_7 = arith.constant 0 : index
    %c0_8 = arith.constant 0 : index
    %13 = vector.load %arg3[%c0_7, %c0_8] : memref<36x72xbf16, #tpu.memory_space<vmem>>, vector<36x72xbf16>
    %cst_9 = arith.constant dense<0.000000e+00> : vector<16x72xf32>
    %14 = tpu.matmul %12, %13, %cst_9 {dimension_numbers = #tpu.dot_dimension_numbers<[1], [0], [0], [1], [0, 0, 1, 1], [], []>} : vector<16x36xbf16>, vector<36x72xbf16>, vector<16x72xf32> -> vector<16x72xf32>
    %c1 = arith.constant 1 : index
    %c0_10 = arith.constant 0 : index
    %15 = vector.load %arg8[%c1, %c0_10] : memref<5x144xf32, #tpu.memory_space<vmem>>, vector<1x72xf32>
    %16 = vector.broadcast %15 : vector<1x72xf32> to vector<16x72xf32>
    %17 = arith.addf %14, %16 : vector<16x72xf32>
    %cst_11 = arith.constant 0.000000e+00 : f32
    %18 = vector.broadcast %cst_11 : f32 to vector<16x72xf32>
    %19 = arith.cmpf ogt, %17, %18 : vector<16x72xf32>
    %cst_12 = arith.constant 0.00999999977 : f32
    %20 = vector.broadcast %cst_12 : f32 to vector<16x72xf32>
    %21 = arith.mulf %20, %17 : vector<16x72xf32>
    %22 = arith.select %19, %17, %21 : vector<16x72xi1>, vector<16x72xf32>
    %23 = arith.truncf %22 : vector<16x72xf32> to vector<16x72xbf16>
    %c0_13 = arith.constant 0 : index
    %c0_14 = arith.constant 0 : index
    %24 = vector.load %arg4[%c0_13, %c0_14] : memref<72x144xbf16, #tpu.memory_space<vmem>>, vector<72x144xbf16>
    %cst_15 = arith.constant dense<0.000000e+00> : vector<16x144xf32>
    %25 = tpu.matmul %23, %24, %cst_15 {dimension_numbers = #tpu.dot_dimension_numbers<[1], [0], [0], [1], [0, 0, 1, 1], [], []>} : vector<16x72xbf16>, vector<72x144xbf16>, vector<16x144xf32> -> vector<16x144xf32>
    %c2 = arith.constant 2 : index
    %c0_16 = arith.constant 0 : index
    %26 = vector.load %arg8[%c2, %c0_16] : memref<5x144xf32, #tpu.memory_space<vmem>>, vector<1x144xf32>
    %27 = vector.broadcast %26 : vector<1x144xf32> to vector<16x144xf32>
    %28 = arith.addf %25, %27 : vector<16x144xf32>
    %cst_17 = arith.constant 0.000000e+00 : f32
    %29 = vector.broadcast %cst_17 : f32 to vector<16x144xf32>
    %30 = arith.cmpf ogt, %28, %29 : vector<16x144xf32>
    %cst_18 = arith.constant 0.00999999977 : f32
    %31 = vector.broadcast %cst_18 : f32 to vector<16x144xf32>
    %32 = arith.mulf %31, %28 : vector<16x144xf32>
    %33 = arith.select %30, %28, %32 : vector<16x144xi1>, vector<16x144xf32>
    %34 = arith.truncf %33 : vector<16x144xf32> to vector<16x144xbf16>
    %c0_19 = arith.constant 0 : index
    %c0_20 = arith.constant 0 : index
    %35 = vector.load %arg5[%c0_19, %c0_20] : memref<144x72xbf16, #tpu.memory_space<vmem>>, vector<144x72xbf16>
    %cst_21 = arith.constant dense<0.000000e+00> : vector<16x72xf32>
    %36 = tpu.matmul %34, %35, %cst_21 {dimension_numbers = #tpu.dot_dimension_numbers<[1], [0], [0], [1], [0, 0, 1, 1], [], []>} : vector<16x144xbf16>, vector<144x72xbf16>, vector<16x72xf32> -> vector<16x72xf32>
    %c3 = arith.constant 3 : index
    %c0_22 = arith.constant 0 : index
    %37 = vector.load %arg8[%c3, %c0_22] : memref<5x144xf32, #tpu.memory_space<vmem>>, vector<1x72xf32>
    %38 = vector.broadcast %37 : vector<1x72xf32> to vector<16x72xf32>
    %39 = arith.addf %36, %38 : vector<16x72xf32>
    %cst_23 = arith.constant 0.000000e+00 : f32
    %40 = vector.broadcast %cst_23 : f32 to vector<16x72xf32>
    %41 = arith.cmpf ogt, %39, %40 : vector<16x72xf32>
    %cst_24 = arith.constant 0.00999999977 : f32
    %42 = vector.broadcast %cst_24 : f32 to vector<16x72xf32>
    %43 = arith.mulf %42, %39 : vector<16x72xf32>
    %44 = arith.select %41, %39, %43 : vector<16x72xi1>, vector<16x72xf32>
    %45 = arith.truncf %44 : vector<16x72xf32> to vector<16x72xbf16>
    %c0_25 = arith.constant 0 : index
    %c0_26 = arith.constant 0 : index
    %46 = vector.load %arg6[%c0_25, %c0_26] : memref<72x36xbf16, #tpu.memory_space<vmem>>, vector<72x36xbf16>
    %cst_27 = arith.constant dense<0.000000e+00> : vector<16x36xf32>
    %47 = tpu.matmul %45, %46, %cst_27 {dimension_numbers = #tpu.dot_dimension_numbers<[1], [0], [0], [1], [0, 0, 1, 1], [], []>} : vector<16x72xbf16>, vector<72x36xbf16>, vector<16x36xf32> -> vector<16x36xf32>
    %c4 = arith.constant 4 : index
    %c0_28 = arith.constant 0 : index
    %48 = vector.load %arg8[%c4, %c0_28] : memref<5x144xf32, #tpu.memory_space<vmem>>, vector<1x36xf32>
    %49 = vector.broadcast %48 : vector<1x36xf32> to vector<16x36xf32>
    %50 = arith.addf %47, %49 : vector<16x36xf32>
    %cst_29 = arith.constant 0.000000e+00 : f32
    %51 = vector.broadcast %cst_29 : f32 to vector<16x36xf32>
    %52 = arith.cmpf ogt, %50, %51 : vector<16x36xf32>
    %cst_30 = arith.constant 0.00999999977 : f32
    %53 = vector.broadcast %cst_30 : f32 to vector<16x36xf32>
    %54 = arith.mulf %53, %50 : vector<16x36xf32>
    %55 = arith.select %52, %50, %54 : vector<16x36xi1>, vector<16x36xf32>
    %56 = arith.truncf %55 : vector<16x36xf32> to vector<16x36xbf16>
    %c0_31 = arith.constant 0 : index
    %c0_32 = arith.constant 0 : index
    %57 = vector.load %arg7[%c0_31, %c0_32] : memref<36x128xbf16, #tpu.memory_space<vmem>>, vector<36x128xbf16>
    %cst_33 = arith.constant dense<0.000000e+00> : vector<16x128xf32>
    %58 = tpu.matmul %56, %57, %cst_33 {dimension_numbers = #tpu.dot_dimension_numbers<[1], [0], [0], [1], [0, 0, 1, 1], [], []>} : vector<16x36xbf16>, vector<36x128xbf16>, vector<16x128xf32> -> vector<16x128xf32>
    %59 = arith.truncf %58 : vector<16x128xf32> to vector<16x128xbf16>
    %c0_34 = arith.constant 0 : index
    %c0_35 = arith.constant 0 : index
    %60 = vector.load %arg9[%c0_34, %c0_35] : memref<16x128xbf16, #tpu.memory_space<vmem>>, vector<16x128xbf16>
    tpu.vector_store %arg9[%c0_34, %c0_35], %59 {strides = array<i32>} : memref<16x128xbf16, #tpu.memory_space<vmem>>, vector<16x128xbf16>,
    return
  }
  func.func @transform_0(%arg0: i32) -> (i32, i32) {
    %c0_i32 = arith.constant 0 : i32
    %c0_i32_0 = arith.constant 0 : i32
    return %arg0, %c0_i32 : i32, i32
  }
  func.func @transform_1(%arg0: i32) -> (i32, i32) {
    %c0_i32 = arith.constant 0 : i32
    %c0_i32_0 = arith.constant 0 : i32
    %c0_i32_1 = arith.constant 0 : i32
    return %c0_i32, %c0_i32_0 : i32, i32
  }
  func.func @transform_2(%arg0: i32) -> (i32, i32) {
    %c0_i32 = arith.constant 0 : i32
    %c0_i32_0 = arith.constant 0 : i32
    %c0_i32_1 = arith.constant 0 : i32
    return %c0_i32, %c0_i32_0 : i32, i32
  }
  func.func @transform_3(%arg0: i32) -> (i32, i32) {
    %c0_i32 = arith.constant 0 : i32
    %c0_i32_0 = arith.constant 0 : i32
    %c0_i32_1 = arith.constant 0 : i32
    return %c0_i32, %c0_i32_0 : i32, i32
  }
  func.func @transform_4(%arg0: i32) -> (i32, i32) {
    %c0_i32 = arith.constant 0 : i32
    %c0_i32_0 = arith.constant 0 : i32
    %c0_i32_1 = arith.constant 0 : i32
    return %c0_i32, %c0_i32_0 : i32, i32
  }
  func.func @transform_5(%arg0: i32) -> (i32, i32) {
    %c0_i32 = arith.constant 0 : i32
    %c0_i32_0 = arith.constant 0 : i32
    %c0_i32_1 = arith.constant 0 : i32
    return %c0_i32, %c0_i32_0 : i32, i32
  }
  func.func @transform_6(%arg0: i32) -> (i32, i32) {
    %c0_i32 = arith.constant 0 : i32
    %c0_i32_0 = arith.constant 0 : i32
    %c0_i32_1 = arith.constant 0 : i32
    return %c0_i32, %c0_i32_0 : i32, i32
  }
  func.func @transform_7(%arg0: i32) -> (i32, i32) {
    %c0_i32 = arith.constant 0 : i32
    %c0_i32_0 = arith.constant 0 : i32
    %c0_i32_1 = arith.constant 0 : i32
    return %c0_i32, %c0_i32_0 : i32, i32
  }
  func.func @transform_8(%arg0: i32) -> (i32, i32) {
    %c0_i32 = arith.constant 0 : i32
    %c0_i32_0 = arith.constant 0 : i32
    return %arg0, %c0_i32 : i32, i32
  }
}

</mosaic_0001>

<bundles_post_ra>
// kernel: multiclass_classification_forward.1
= control target key start
LH: loop header
LB: loop body
LE: loop exit
PB: predicated region body
PF: predicated region fallthrough
CT: control target
= control target key end

     0   :  { %vm50_vm0 = vcmask 1041408   ;;  %vm46_vm1 = vcmask 162816   ;;  %vm189_vm2 = vcmask 1043456   ;;  %vm96_vm5 = vcmask 293888   ;;  %s802_s1 = inlined_call_operand.vmem [shape: bf16[20,36], index: 1, kind: input, shape index: {}]   ;;  %s803_s0 = inlined_call_operand.vmem [shape: f32[16,20], index: 0, kind: input, shape index: {}]   ;;  %s804_s2 = inlined_call_operand.vmem [shape: bf16[36,72], index: 2, kind: input, shape index: {}]   ;;  %s805_s3 = inlined_call_operand.vmem [shape: bf16[72,144], index: 3, kind: input, shape index: {}]   ;;  %s806_s7 = inlined_call_operand.vmem [shape: f32[5,144], index: 7, kind: input, shape index: {}]   ;;  %s807_s4 = inlined_call_operand.vmem [shape: bf16[144,72], index: 4, kind: input, shape index: {}]   ;;  %s808_s5 = inlined_call_operand.vmem [shape: bf16[72,36], index: 5, kind: input, shape index: {}]   ;;  %s809_s6 = inlined_call_operand.vmem [shape: bf16[36,128], index: 6, kind: input, shape index: {}]   ;;  %s810_s8 = inlined_call_operand.vmem [shape: bf16[16,128], index: 8, kind: output, shape index: {}]  }
   0x1   :  { %v35_v0 = vld [vmem:[%s802_s1 + $0x8] sm:$0x3]  ;;  %v574_v4 = vld [vmem:[%s802_s1] sm:$0xff]  ;;  %v79_v8 = vld [vmem:[%s804_s2 + $0x10] sm:$0x3]  ;;  %vm185_vm8 = vcmask 588800  }
   0x2   :  { %v42_v1 = vunpack.c.l.b16 %v35_v0  ;;  %v30_v5 = vld [vmem:[%s803_s0] sm:$0xff]  ;;  %v31_v6 = vld [vmem:[%s803_s0 + $0x8] sm:$0xff]  ;;  %v90_v9 = vunpack.c.l.b16 %v79_v8  ;;  %v503_v31 = vld [vmem:[%s805_s3 + $0x30] sm:$0xf]  ;;  %vm311_vm13 = vcmask 130048  }
   0x3   :  { %v32_v7 = vpack.c.bf16 %v31_v6, %v30_v5  ;;  %v576_v12 = vld [vmem:[%s804_s2 + $0x8] sm:$0xff]  ;;  %v575_v13 = vld [vmem:[%s804_s2] sm:$0xff]  ;;  %v584_v32 = vld [vmem:[%s805_s3 + $0x34] sm:$0xf0] }
   0x4   :  { %v44_v2 = vpack.c.b16 %v42_v1, %v42_v1  ;;  %v93_v10 = vpack.c.b16 %v90_v9, %v90_v9  ;;  %v132_v14 = vld [vmem:[%s805_s3 + $0x40] sm:$0xff]  ;;  %v583_v33 = vld [vmem:[%s805_s3 + $0x34] sm:$0xf]  ;;  %v504_v34 = vor.u32 %v584_v32, %v503_v31  ;;  %v505_v35 = vld [vmem:[%s805_s3 + $0x38] sm:$0xf0] }
   0x5   :  { %v165_v15 = vunpack.c.l.b16 %v132_v14  ;;  %v166_v16 = vunpack.c.h.b16 %v132_v14  ;;  %v36_v22 = vld [vmem:[%s806_s7] ss:$0 sm:$0xff]  ;;  %v508_v36 = vor.u32 %v583_v33, %v505_v35  ;;  %v582_v38 = vld [vmem:[%s805_s3 + $0x24] sm:$0xf0]  ;;  %v581_v39 = vld [vmem:[%s805_s3 + $0x24] sm:$0xf] }
   0x6   :  { %v52_v3 = vsel %vm50_vm0, %v44_v2, 0  ;;  %v101_v11 = vsel %vm50_vm0, %v93_v10, 0  ;;  %v495_v37 = vld [vmem:[%s805_s3 + $0x20] sm:$0xf]  ;;  %v497_v41 = vld [vmem:[%s805_s3 + $0x28] sm:$0xf0] }
   0x7   :  { %60 = vmatpush.bf16.msra.mxu0 %v52_v3  ;;  %108 = vmatpush.bf16.msra.mxu1 %v101_v11  ;;  %v175_v17 = vpack.c.b16 %v165_v15, %v165_v15  ;;  %v176_v18 = vpack.c.b16 %v166_v16, %v166_v16  ;;  %v496_v40 = vor.u32 %v582_v38, %v495_v37  ;;  %v487_v43 = vld [vmem:[%s805_s3 + $0x10] sm:$0xf]  ;;  %v580_v44 = vld [vmem:[%s805_s3 + $0x14] sm:$0xf0]  ;;  %v579_v45 = vld [vmem:[%s805_s3 + $0x14] sm:$0xf] }
   0x8   :  { %v500_v42 = vor.u32 %v581_v39, %v497_v41  ;;  %v488_v46 = vor.u32 %v580_v44, %v487_v43  ;;  %v489_v47 = vld [vmem:[%s805_s3 + $0x18] sm:$0xf0]  ;;  %v479_v49 = vld [vmem:[%s805_s3] sm:$0xf]  ;;  %v578_v50 = vld [vmem:[%s805_s3 + $0x4] sm:$0xf0] }
   0x9   :  { %v191_v19 = vsel %vm189_vm2, %v175_v17, 0  ;;  %v194_v20 = vsel %vm189_vm2, %v176_v18, 0  ;;  %v492_v48 = vor.u32 %v579_v45, %v489_v47  ;;  %v577_v51 = vld [vmem:[%s805_s3 + $0x4] sm:$0xf]  ;;  %v480_v52 = vor.u32 %v578_v50, %v479_v49  ;;  %v481_v53 = vld [vmem:[%s805_s3 + $0x8] sm:$0xf0] }
   0xa   :  { %199 = vmatpush.bf16.msra.mxu2 %v191_v19  ;;  %213 = vmatpush.bf16.msra.mxu3 %v194_v20  ;;  %v484_v54 = vor.u32 %v577_v51, %v481_v53  ;;  %v592_v55 = vld [vmem:[%s807_s4 + $0x38] sm:$0xff]  ;;  %v591_v56 = vld [vmem:[%s807_s4 + $0x30] sm:$0xff]  ;;  %v590_v57 = vld [vmem:[%s807_s4 + $0x28] sm:$0xff] }
   0xb   :  { %61 = vmatpush.bf16.msra.mxu0 %v574_v4  ;;  %109 = vmatpush.bf16.msra.mxu1 %v576_v12  ;;  %v589_v58 = vld [vmem:[%s807_s4 + $0x20] sm:$0xff]  ;;  %v588_v5 = vld [vmem:[%s807_s4 + $0x18] sm:$0xff]  ;;  %v587_v6 = vld [vmem:[%s807_s4 + $0x10] sm:$0xff] }
   0xc   :  { %v80_v60 = vld [vmem:[%s806_s7 + $0x1] ss:$0 sm:$0xff]  ;;  %v586_v8 = vld [vmem:[%s807_s4 + $0x8] sm:$0xff]  ;;  %v597_v35 = vld [vmem:[%s808_s5 + $0x18] sm:$0xff] }
   0xd   :  { %v585_v9 = vld [vmem:[%s807_s4] sm:$0xff]  ;;  %v595_v37 = vld [vmem:[%s808_s5 + $0x8] sm:$0xff]  ;;  %v418_v53 = vld [vmem:[%s809_s6 + $0x10] sm:$0x3] }
   0xe   :  { %466 = vmatmul.msk.bf16.vlgmr.msra.gmra.mxu0 %vm46_vm1, %v32_v7  ;;  %200 = vmatpush.bf16.msra.mxu2 %v504_v34  ;;  %v593_v7 = vld [vmem:[%s807_s4 + $0x40] sm:$0xff] }
   0xf   :  { %110 = vmatpush.bf16.msra.mxu1 %v575_v13  ;;  %214 = vmatpush.bf16.msra.mxu3 %v508_v36  ;;  %v358_v10 = vld [vmem:[%s808_s5 + $0x20] sm:$0xf]  ;;  %v596_v36 = vld [vmem:[%s808_s5 + $0x10] sm:$0xff] }
  0x10   :  { %315 = vmatpush.bf16.msrb.mxu0 %v592_v55  ;;  %v377_v11 = vunpack.c.l.b16 %v358_v10  ;;  %v476_v14 = vld [vmem:[%s806_s7 + $0x2] ss:$8 sm:$0x3]  ;;  %v256_v39 = vld [vmem:[%s806_s7 + $0x3] ss:$0 sm:$0xff] }
  0x11   :  { %v136_v17 = vperm.slane %v476_v14, 0  ;;  %v137_v18 = vperm.slane %v476_v14, 1  ;;  %v594_v38 = vld [vmem:[%s808_s5] sm:$0xff] }
  0x12   :  { %201 = vmatpush.bf16.msra.mxu2 %v496_v40  ;;  %v382_v12 = vpack.c.b16 %v377_v11, %v377_v11 }
  0x13   :  { %215 = vmatpush.bf16.msra.mxu3 %v500_v42  ;;  %336 = vmatpush.bf16.msrb.mxu1 %v593_v7 }
  0x14   :  { %316 = vmatpush.bf16.msrb.mxu0 %v591_v56  ;;  %v391_v13 = vsel %vm189_vm2, %v382_v12, 0 }
  0x16   :  { %202 = vmatpush.bf16.msra.mxu2 %v488_v46 }
  0x17   :  { %216 = vmatpush.bf16.msra.mxu3 %v492_v48 }
  0x18   :  { %317 = vmatpush.bf16.msrb.mxu0 %v590_v57  ;;  %v599_v57 = vld [vmem:[%s809_s6 + $0x8] sm:$0xff] }
  0x1a   :  { %203 = vmatpush.bf16.msra.mxu2 %v480_v52 }
  0x1b   :  { %217 = vmatpush.bf16.msra.mxu3 %v484_v54  ;;  %v428_v54 = vunpack.c.l.b16 %v418_v53 }
  0x1c   :  { %318 = vmatpush.bf16.msrb.mxu0 %v589_v58  ;;  %v598_v58 = vld [vmem:[%s809_s6] sm:$0xff] }
  0x1d   :  { %v431_v55 = vpack.c.b16 %v428_v54, %v428_v54 }
  0x1e   :  { %396 = vmatpush.bf16.msrb.mxu2 %v391_v13 }
  0x1f   :  { %v438_v56 = vsel %vm50_vm0, %v431_v55, 0 }
  0x20   :  { %319 = vmatpush.bf16.msrb.mxu0 %v588_v5  ;;  %445 = vmatpush.bf16.msrb.mxu3 %v438_v56 }
  0x22   :  { %397 = vmatpush.bf16.msrb.mxu2 %v597_v35 }
  0x24   :  { %320 = vmatpush.bf16.msrb.mxu0 %v587_v6  ;;  %446 = vmatpush.bf16.msrb.mxu3 %v599_v57 }
  0x26   :  { %398 = vmatpush.bf16.msrb.mxu2 %v596_v36 }
  0x28   :  { %321 = vmatpush.bf16.msrb.mxu0 %v586_v8  ;;  %447 = vmatpush.bf16.msrb.mxu3 %v598_v58 }
  0x2a   :  { %399 = vmatpush.bf16.msrb.mxu2 %v595_v37 }
  0x2c   :  { %322 = vmatpush.bf16.msrb.mxu0 %v585_v9 }
  0x2e   :  { %400 = vmatpush.bf16.msrb.mxu2 %v594_v38 }
  0x8b   :  { %v63_v21 = vpop.f32.mrf.mxu0 }
  0x8c   :  { %v64_v23 = vadd.f32 %v63_v21, %v36_v22 }
  0x8e   :  { %v70_v25 = vmul.f32 0.01, %v64_v23  ;;  %vm68_vm3 = vcmp.gt.f32.partialorder %v64_v23, 0.0 }
  0x90   :  { %v72_v28 = vsel %vm68_vm3, %v64_v23, %v70_v25 }
  0x93   :  { %v65_v24 = vpop.f32.mrf.mxu0 }
  0x94   :  { %v66_v26 = vadd.f32 %v65_v24, %v36_v22 }
  0x96   :  { %vm69_vm4 = vcmp.gt.f32.partialorder %v66_v26, 0.0  ;;  %v71_v27 = vmul.f32 0.01, %v66_v26 }
  0x98   :  { %v73_v29 = vsel %vm69_vm4, %v66_v26, %v71_v27 }
  0x99   :  { %v74_v30 = vpack.c.bf16 %v73_v29, %v72_v28 }
  0x9b   :  { %475 = vmatmul.msk.bf16.vlgmr.msra.gmra.mxu1 %vm96_vm5, %v74_v30 }
 0x118   :  { %v112_v59 = vpop.f32.mrf.mxu1 }
 0x119   :  { %v113_v61 = vadd.f32 %v112_v59, %v80_v60 }
 0x11b   :  { %v119_v63 = vmul.f32 0.01, %v113_v61  ;;  %vm117_vm6 = vcmp.gt.f32.partialorder %v113_v61, 0.0 }
 0x11d   :  { %v121_v2 = vsel %vm117_vm6, %v113_v61, %v119_v63 }
 0x120   :  { %v114_v62 = vpop.f32.mrf.mxu1 }
 0x121   :  { %v115_v0 = vadd.f32 %v114_v62, %v80_v60  ;;  %v359_v60 = vld [vmem:[%s806_s7 + $0x4] ss:$0 sm:$0xff] }
 0x123   :  { %vm118_vm7 = vcmp.gt.f32.partialorder %v115_v0, 0.0  ;;  %v120_v1 = vmul.f32 0.01, %v115_v0 }
 0x125   :  { %v122_v3 = vsel %vm118_vm7, %v115_v0, %v120_v1 }
 0x126   :  { %v123_v4 = vpack.c.bf16 %v122_v3, %v121_v2 }
 0x128   :  { %509 = vmatmul.msk.bf16.vlgmr.msra.gmra.mxu2 %vm185_vm8, %v123_v4  ;;  %510 = vmatmul.msk.bf16.vlgmr.msra.gmra.mxu3 %vm185_vm8, %v123_v4 }
 0x1ab   :  { %v205_v15 = vpop.f32.mrf.mxu2  ;;  %v219_v16 = vpop.f32.mrf.mxu3 }
 0x1ac   :  { %v206_v19 = vadd.f32 %v205_v15, %v136_v17  ;;  %v220_v20 = vadd.f32 %v219_v16, %v137_v18 }
 0x1ae   :  { %v228_v23 = vmul.f32 0.01, %v206_v19  ;;  %v229_v24 = vmul.f32 0.01, %v220_v20  ;;  %vm224_vm9 = vcmp.gt.f32.partialorder %v206_v19, 0.0  ;;  %vm225_vm10 = vcmp.gt.f32.partialorder %v220_v20, 0.0 }
 0x1b0   :  { %v233_v29 = vsel %vm225_vm10, %v220_v20, %v229_v24  ;;  %v232_v31 = vsel %vm224_vm9, %v206_v19, %v228_v23 }
 0x1b3   :  { %v207_v21 = vpop.f32.mrf.mxu2  ;;  %v221_v22 = vpop.f32.mrf.mxu3 }
 0x1b4   :  { %v208_v25 = vadd.f32 %v207_v21, %v136_v17  ;;  %v222_v26 = vadd.f32 %v221_v22, %v137_v18 }
 0x1b6   :  { %vm226_vm11 = vcmp.gt.f32.partialorder %v208_v25, 0.0  ;;  %v230_v27 = vmul.f32 0.01, %v208_v25  ;;  %vm227_vm12 = vcmp.gt.f32.partialorder %v222_v26, 0.0  ;;  %v231_v28 = vmul.f32 0.01, %v222_v26 }
 0x1b8   :  { %v235_v30 = vsel %vm227_vm12, %v222_v26, %v231_v28  ;;  %v234_v32 = vsel %vm226_vm11, %v208_v25, %v230_v27 }
 0x1b9   :  { %v237_v33 = vpack.c.bf16 %v235_v30, %v233_v29  ;;  %v236_v34 = vpack.c.bf16 %v234_v32, %v232_v31 }
 0x1bb   :  { %323 = vmatmul.bf16.vlgmr.msrb.gmra.mxu0 %v236_v34  ;;  %547 = vmatmul.msk.bf16.vlgmr.msrb.gmra.mxu1 %vm311_vm13, %v237_v33 }
 0x238   :  { %v324_v40 = vpop.f32.mrf.mxu0  ;;  %v338_v41 = vpop.f32.mrf.mxu1 }
 0x239   :  { %v325_v42 = vadd.f32 %v324_v40, %v256_v39 }
 0x23b   :  { %v339_v43 = vadd.f32 %v338_v41, %v325_v42 }
 0x23d   :  { %v345_v47 = vmul.f32 0.01, %v339_v43  ;;  %vm343_vm14 = vcmp.gt.f32.partialorder %v339_v43, 0.0 }
 0x23f   :  { %v347_v50 = vsel %vm343_vm14, %v339_v43, %v345_v47 }
 0x240   :  { %v326_v44 = vpop.f32.mrf.mxu0  ;;  %v340_v46 = vpop.f32.mrf.mxu1 }
 0x241   :  { %v327_v45 = vadd.f32 %v326_v44, %v256_v39 }
 0x243   :  { %v341_v48 = vadd.f32 %v340_v46, %v327_v45 }
 0x245   :  { %vm344_vm15 = vcmp.gt.f32.partialorder %v341_v48, 0.0  ;;  %v346_v49 = vmul.f32 0.01, %v341_v48 }
 0x247   :  { %v348_v51 = vsel %vm344_vm15, %v341_v48, %v346_v49 }
 0x248   :  { %v349_v52 = vpack.c.bf16 %v348_v51, %v347_v50 }
 0x24a   :  { %564 = vmatmul.msk.bf16.vlgmr.msrb.gmra.mxu2 %vm185_vm8, %v349_v52 }
 0x2cd   :  { %v402_v59 = vpop.f32.mrf.mxu2 }
 0x2ce   :  { %v403_v61 = vadd.f32 %v402_v59, %v359_v60 }
 0x2d0   :  { %v409_v63 = vmul.f32 0.01, %v403_v61  ;;  %vm407_vm0 = vcmp.gt.f32.partialorder %v403_v61, 0.0 }
 0x2d2   :  { %v411_v2 = vsel %vm407_vm0, %v403_v61, %v409_v63 }
 0x2d5   :  { %v404_v62 = vpop.f32.mrf.mxu2 }
 0x2d6   :  { %v405_v0 = vadd.f32 %v404_v62, %v359_v60 }
 0x2d8   :  { %vm408_vm1 = vcmp.gt.f32.partialorder %v405_v0, 0.0  ;;  %v410_v1 = vmul.f32 0.01, %v405_v0 }
 0x2da   :  { %v412_v3 = vsel %vm408_vm1, %v405_v0, %v410_v1 }
 0x2db   :  { %v413_v4 = vpack.c.bf16 %v412_v3, %v411_v2 }
 0x2dd   :  { %573 = vmatmul.msk.bf16.vlgmr.msrb.gmra.mxu3 %vm96_vm5, %v413_v4 }
 0x360   :  { %v449_v5 = vpop.f32.mrf.mxu3 }
 0x368   :  { %v451_v6 = vpop.f32.mrf.mxu3 }
 0x369   :  { %v603_v7 = vpack.c.bf16 %v451_v6, %v449_v5 }
 0x36b   :  { %604 = vst [vmem:[%s810_s8] sm:$0xff] %v603_v7  }

</bundles_post_ra>
